<compile_context>
chip_gen: v7x
topology: tpu7x:2x2x1
jax: 0.10.0
libtpu: 0.0.40
codegen_flags: <defaults>
</compile_context>

<pallas_src>
import functools

import jax
import jax.numpy as jnp
from jax.experimental import pallas as pl
from jax.experimental.pallas import tpu as pltpu

IN_FEATURES = 8
_PAD = 8                  # every layer zero-padded to (8, 8)
_SLAB_ROWS = 3 * _PAD     # 24
_SLAB_COLS = 128          # lane-padded slab; col 8 holds the bias column


def _round_up(x, m):
    return ((x + m - 1) // m) * m


def _sigmoid(z):
    # sigmoid(z) == 0.5 * (tanh(z/2) + 1): single EUP op, no full-precision divide.
    return 0.5 * (jnp.tanh(z * 0.5) + 1.0)


def _mlp_kernel(x_ref, p_ref, o_ref):
    """Fused 3-layer MLP; activations laid out (features, TILE_N)."""
    # Resident packed parameters: rows [8l : 8l+8] = [W_l (8x8, zero-padded) | b_l].
    w1 = p_ref[0:8, 0:8]
    b1 = p_ref[0:8, 8:9]
    w2 = p_ref[8:16, 0:8]
    b2 = p_ref[8:16, 8:9]
    w3 = p_ref[16:24, 0:8]
    b3 = p_ref[16:24, 8:9]

    x = x_ref[...]                                        # (TILE_N, 8) f32

    # Layer 1: contract x's feature axis -> (8, TILE_N); batch on the lane axis.
    z1 = jax.lax.dot_general(
        w1, x, dimension_numbers=(((1,), (1,)), ((), ())),
        preferred_element_type=jnp.float32)
    h1 = _sigmoid(z1 + b1)                                # (8, TILE_N)

    h2 = _sigmoid(jnp.dot(w2, h1, preferred_element_type=jnp.float32) + b2)
    y = _sigmoid(jnp.dot(w3, h2, preferred_element_type=jnp.float32) + b3)

    # Row 0 is the real 1-wide output; padded rows were multiplied by zero weights.
    o_ref[...] = y[0:1, :].astype(o_ref.dtype)


@functools.partial(jax.jit, static_argnames=("tile_n",))
def mlp_forward(x, slab, *, tile_n=4096):
    """x: (N, 8) f32, slab: packed (24, 128) f32 params -> (N, 1) f32.

    tile_n: batch rows per grid step. Larger tiles amortize the ~0.35us/step
    overhead (size up on v6e/v7x, down on v5e); even 8192 rows is well under
    the scoped VMEM limit on all generations.
    """
    n, f = x.shape
    assert f == IN_FEATURES, f"expected {IN_FEATURES} input features, got {f}"

    tile = min(_round_up(tile_n, 128), _round_up(n, 128))
    n_pad = _round_up(n, tile)
    if n_pad != n:
        x = jnp.pad(x, ((0, n_pad - n), (0, 0)))

    out = pl.pallas_call(
        _mlp_kernel,
        out_shape=jax.ShapeDtypeStruct((1, n_pad), jnp.float32),
        grid=(n_pad // tile,),
        in_specs=[
            pl.BlockSpec((tile, IN_FEATURES), lambda i: (i, 0)),        # streamed x tile
            pl.BlockSpec((_SLAB_ROWS, _SLAB_COLS), lambda i: (0, 0)),   # resident params
        ],
        out_specs=pl.BlockSpec((1, tile), lambda i: (0, i)),            # lane-dense output
        compiler_params=pltpu.CompilerParams(
            dimension_semantics=("parallel",)),    # shard batch steps across TCs (v7x)
    )(x, slab)
    return out[0, :n].reshape(n, 1)


def init_params(key):
    """torch.nn.Linear default init: U(-1/sqrt(fan_in), +1/sqrt(fan_in)).

    Weights kept in torch (out_features, in_features) layout; biases (out,).
    """
    dims = [(8, 6), (6, 4), (4, 1)]
    params = []
    for fan_in, fan_out in dims:
        kw, kb, key = jax.random.split(key, 3)
        bound = 1.0 / float(fan_in) ** 0.5
        w = jax.random.uniform(kw, (fan_out, fan_in), jnp.float32, -bound, bound)
        b = jax.random.uniform(kb, (fan_out,), jnp.float32, -bound, bound)
        params.append((w, b))
    return params


def pack_params(params):
    """Pack [(W1,b1),(W2,b2),(W3,b3)] into a single (24, 128) f32 slab.

    Row block l*8:(l+1)*8 holds layer l: W zero-padded to (8, 8) in cols 0:8,
    bias in col 8.  Zero padding keeps the math exact: spurious sigmoid(0)=0.5
    rows of a padded activation are multiplied by zero columns downstream.
    """
    slab = jnp.zeros((_SLAB_ROWS, _SLAB_COLS), jnp.float32)
    for l, (w, b) in enumerate(params):
        out_f, in_f = w.shape
        r = l * _PAD
        slab = slab.at[r:r + out_f, 0:in_f].set(w)
        slab = slab.at[r:r + out_f, 8].set(b)
    return slab


def reference_forward(x, params):
    """Pure-JAX reference (torch layout: y = x @ W.T + b)."""
    (w1, b1), (w2, b2), (w3, b3) = params
    h1 = jax.nn.sigmoid(x @ w1.T + b1)
    h2 = jax.nn.sigmoid(h1 @ w2.T + b2)
    return jax.nn.sigmoid(h2 @ w3.T + b3)


if __name__ == "__main__":
    key = jax.random.PRNGKey(0)
    kx, kp = jax.random.split(key)

    batch = 759  # diabetes.csv row count; exercises padding (759 -> 768)
    x = jax.random.normal(kx, (batch, IN_FEATURES), jnp.float32)

    params = init_params(kp)
    slab = pack_params(params)

    # Small tile in the demo so the batch grid actually takes several
    # pipelined steps (768 / 256 = 3); production default is tile_n=4096.
    y = mlp_forward(x, slab, tile_n=256)
    y = jax.block_until_ready(y)

    y_ref = reference_forward(x, params)
    assert y.shape == (batch, 1)
    assert jnp.allclose(y, y_ref, atol=1e-5, rtol=1e-5), float(
        jnp.max(jnp.abs(y - y_ref)))

    print("KERNEL_OK")
</pallas_src>

<mosaic_0001>
module attributes {stable_mosaic.version = 11 : i64} {
  func.func @_mlp_kernel(%arg0: i32, %arg1: memref<256x8xf32, #tpu.memory_space<vmem>>, %arg2: memref<24x128xf32, #tpu.memory_space<vmem>>, %arg3: memref<1x256xf32, #tpu.memory_space<vmem>>) attributes {dimension_semantics = [#tpu.dimension_semantics<parallel>], iteration_bounds = array<i64: 3>, scalar_prefetch = 0 : i64, scratch_operands = 0 : i64, tpu.core_type = #tpu.core_type<tc>, window_params = [{transform_indices = @transform_0, window_bounds = array<i64: 256, 8>}, {pipeline_mode = #tpu.pipeline_mode<synchronous>, transform_indices = @transform_1, window_bounds = array<i64: 24, 128>}, {transform_indices = @transform_2, window_bounds = array<i64: 1, 256>}]} {
    %c0 = arith.constant 0 : index
    %c0_0 = arith.constant 0 : index
    %0 = vector.load %arg2[%c0, %c0_0] : memref<24x128xf32, #tpu.memory_space<vmem>>, vector<8x8xf32>
    %c0_1 = arith.constant 0 : index
    %c8 = arith.constant 8 : index
    %1 = vector.load %arg2[%c0_1, %c8] : memref<24x128xf32, #tpu.memory_space<vmem>>, vector<8x1xf32>
    %c8_2 = arith.constant 8 : index
    %c0_3 = arith.constant 0 : index
    %2 = vector.load %arg2[%c8_2, %c0_3] : memref<24x128xf32, #tpu.memory_space<vmem>>, vector<8x8xf32>
    %c8_4 = arith.constant 8 : index
    %c8_5 = arith.constant 8 : index
    %3 = vector.load %arg2[%c8_4, %c8_5] : memref<24x128xf32, #tpu.memory_space<vmem>>, vector<8x1xf32>
    %c16 = arith.constant 16 : index
    %c0_6 = arith.constant 0 : index
    %4 = vector.load %arg2[%c16, %c0_6] : memref<24x128xf32, #tpu.memory_space<vmem>>, vector<8x8xf32>
    %c16_7 = arith.constant 16 : index
    %c8_8 = arith.constant 8 : index
    %5 = vector.load %arg2[%c16_7, %c8_8] : memref<24x128xf32, #tpu.memory_space<vmem>>, vector<8x1xf32>
    %c0_9 = arith.constant 0 : index
    %c0_10 = arith.constant 0 : index
    %6 = vector.load %arg1[%c0_9, %c0_10] : memref<256x8xf32, #tpu.memory_space<vmem>>, vector<256x8xf32>
    %cst = arith.constant dense<0.000000e+00> : vector<8x256xf32>
    %7 = tpu.matmul %0, %6, %cst {dimension_numbers = #tpu.dot_dimension_numbers<[1], [1], [0], [0], [0, 0, 1, 0], [], []>} : vector<8x8xf32>, vector<256x8xf32>, vector<8x256xf32> -> vector<8x256xf32>
    %8 = vector.broadcast %1 : vector<8x1xf32> to vector<8x256xf32>
    %9 = arith.addf %7, %8 : vector<8x256xf32>
    %cst_11 = arith.constant 5.000000e-01 : f32
    %10 = vector.broadcast %cst_11 : f32 to vector<8x256xf32>
    %11 = arith.mulf %9, %10 : vector<8x256xf32>
    %12 = math.tanh %11 : vector<8x256xf32>
    %cst_12 = arith.constant 1.000000e+00 : f32
    %13 = vector.broadcast %cst_12 : f32 to vector<8x256xf32>
    %14 = arith.addf %12, %13 : vector<8x256xf32>
    %cst_13 = arith.constant 5.000000e-01 : f32
    %15 = vector.broadcast %cst_13 : f32 to vector<8x256xf32>
    %16 = arith.mulf %15, %14 : vector<8x256xf32>
    %cst_14 = arith.constant dense<0.000000e+00> : vector<8x256xf32>
    %17 = tpu.matmul %2, %16, %cst_14 {dimension_numbers = #tpu.dot_dimension_numbers<[1], [0], [0], [1], [0, 0, 1, 1], [], []>} : vector<8x8xf32>, vector<8x256xf32>, vector<8x256xf32> -> vector<8x256xf32>
    %18 = vector.broadcast %3 : vector<8x1xf32> to vector<8x256xf32>
    %19 = arith.addf %17, %18 : vector<8x256xf32>
    %cst_15 = arith.constant 5.000000e-01 : f32
    %20 = vector.broadcast %cst_15 : f32 to vector<8x256xf32>
    %21 = arith.mulf %19, %20 : vector<8x256xf32>
    %22 = math.tanh %21 : vector<8x256xf32>
    %cst_16 = arith.constant 1.000000e+00 : f32
    %23 = vector.broadcast %cst_16 : f32 to vector<8x256xf32>
    %24 = arith.addf %22, %23 : vector<8x256xf32>
    %cst_17 = arith.constant 5.000000e-01 : f32
    %25 = vector.broadcast %cst_17 : f32 to vector<8x256xf32>
    %26 = arith.mulf %25, %24 : vector<8x256xf32>
    %cst_18 = arith.constant dense<0.000000e+00> : vector<8x256xf32>
    %27 = tpu.matmul %4, %26, %cst_18 {dimension_numbers = #tpu.dot_dimension_numbers<[1], [0], [0], [1], [0, 0, 1, 1], [], []>} : vector<8x8xf32>, vector<8x256xf32>, vector<8x256xf32> -> vector<8x256xf32>
    %28 = vector.broadcast %5 : vector<8x1xf32> to vector<8x256xf32>
    %29 = arith.addf %27, %28 : vector<8x256xf32>
    %cst_19 = arith.constant 5.000000e-01 : f32
    %30 = vector.broadcast %cst_19 : f32 to vector<8x256xf32>
    %31 = arith.mulf %29, %30 : vector<8x256xf32>
    %32 = math.tanh %31 : vector<8x256xf32>
    %cst_20 = arith.constant 1.000000e+00 : f32
    %33 = vector.broadcast %cst_20 : f32 to vector<8x256xf32>
    %34 = arith.addf %32, %33 : vector<8x256xf32>
    %cst_21 = arith.constant 5.000000e-01 : f32
    %35 = vector.broadcast %cst_21 : f32 to vector<8x256xf32>
    %36 = arith.mulf %35, %34 : vector<8x256xf32>
    %37 = vector.extract_strided_slice %36 {offsets = [0, 0], sizes = [1, 256], strides = [1, 1]} : vector<8x256xf32> to vector<1x256xf32>
    %c0_22 = arith.constant 0 : index
    %c0_23 = arith.constant 0 : index
    %38 = vector.load %arg3[%c0_22, %c0_23] : memref<1x256xf32, #tpu.memory_space<vmem>>, vector<1x256xf32>
    tpu.vector_store %arg3[%c0_22, %c0_23], %37 {strides = array<i32>} : memref<1x256xf32, #tpu.memory_space<vmem>>, vector<1x256xf32>,
    return
  }
  func.func @transform_0(%arg0: i32) -> (i32, i32) {
    %c0_i32 = arith.constant 0 : i32
    %c0_i32_0 = arith.constant 0 : i32
    return %arg0, %c0_i32 : i32, i32
  }
  func.func @transform_1(%arg0: i32) -> (i32, i32) {
    %c0_i32 = arith.constant 0 : i32
    %c0_i32_0 = arith.constant 0 : i32
    %c0_i32_1 = arith.constant 0 : i32
    return %c0_i32, %c0_i32_0 : i32, i32
  }
  func.func @transform_2(%arg0: i32) -> (i32, i32) {
    %c0_i32 = arith.constant 0 : i32
    %c0_i32_0 = arith.constant 0 : i32
    return %c0_i32, %arg0 : i32, i32
  }
}

</mosaic_0001>

<bundles_post_ra>
// kernel: mlp_forward.1
= control target key start
LH: loop header
LB: loop body
LE: loop exit
PB: predicated region body
PF: predicated region fallthrough
CT: control target
= control target key end

     0   :  { %s786_s9 = smov 0   ;;  %s901_s0 = inlined_call_operand.vmem [shape: f32[768,8], index: 0, kind: input, shape index: {}]   ;;  %s902_s1 = inlined_call_operand.vmem [shape: f32[24,128], index: 1, kind: input, shape index: {}]   ;;  %s903_s2 = inlined_call_operand.vmem [shape: f32[1,768], index: 2, kind: output, shape index: {}]  }
   0x1 LB: > { %s608_s10 = sadd.s32 4294967295, %s766_s9   ;;  %p612_p0 = scmp.ge.s32.totalorder %s766_s9, 1  ;;  %s766_s9 = sphi %s786_s9, %s12_s9  }
   0x2   : > { %p113_p1 = scmp.lt.s32.totalorder %s766_s9, 4 }
   0x4   : > { %p114_p2 = pnand %p612_p0, %p113_p1 }
   0x5   : > { %s613_s11 = sshll.u32 (!%p114_p2), %s608_s10, 5  ;;  %vm185_vm0 = vcmask (!%p114_p2), 64512   ;;  %v799_v0 = vld [vmem:[%s902_s1] sm:$0xff] (!%p114_p2)  ;;  %v768_v1 = vmov (!%p114_p2), 8   ;;  %v807_v2 = vld [vmem:[%s902_s1 + $0x8] sm:$0xff] (!%p114_p2)  ;;  %v769_v52 = vmov (!%p114_p2), 0.0  }
   0x6   : > { %117 = sbr.rel (%p114_p2) target bundleno = 790 (0x316), region = 28  ;;  %p135_p3 = scmp.lt.s32.totalorder (!%p114_p2), %s613_s11, 95  ;;  %685 = vmatprep.mubr.msk.f32.mxu0 (!%p114_p2), %vm185_vm0, %v799_v0  ;;  %746 = vset.pattern.permute.xlu0 (!%p114_p2), %v768_v1  ;;  %vm816_vm1 = vmpackc.low (!%p114_p2), %vm185_vm0, %vm185_vm0 }
   0x7   : > { %182 = vperm.xlu0 (!%p114_p2), %746, %v799_v0   ;;  %747 = vset.pattern.permute.xlu1 (!%p114_p2), %v768_v1  ;;  %s615_s22 = sshll.u32 (!%p114_p2), %s608_s10, 1 }
   0x8   : > { %434 = vmatprep.mubr.f32.mxu1 (!%p114_p2), %v769_v52  ;;  %p141_p4 = scmp.lt.s32.totalorder (!%p114_p2), %s615_s22, 5 }
   0xb   : > { %365 = vperm.xlu0 (!%p114_p2), %746, %v807_v2  }
   0xd   : > { %s907_s11 = smov (!%p135_p3, %s613_s11), 95  ;;  %s909_s22 = smov (!%p141_p4, %s615_s22), 5 }
   0xe   : > { %s614_s16 = sshll.u32 %s907_s11, 3  ;;  %s143_s25 = scalar_lea.vmem %s903_s2, %s909_s22 }
   0xf   : > { %s812_s19 = scalar_lea.vmem %s901_s0, %s614_s16 }
  0x10   : > { %v164_v4 = vld [vmem:[%s812_s19 + $0x80] sm:$0xff]  ;;  %v165_v5 = vld [vmem:[%s812_s19 + $0x88] sm:$0xff]  ;;  %v166_v9 = vld [vmem:[%s812_s19 + $0x90] sm:$0xff] }
  0x11   : > { %v148_v6 = vld [vmem:[%s812_s19] sm:$0xff]  ;;  %v687_v7 = vpack.c.bf16 %v165_v5, %v164_v4  ;;  %v149_v8 = vld [vmem:[%s812_s19 + $0x8] sm:$0xff]  ;;  %v167_v10 = vld [vmem:[%s812_s19 + $0x98] sm:$0xff] }
  0x12   : > { %v690_v11 = vpack.c.bf16 %v149_v8, %v148_v6  ;;  %v693_v12 = vpack.c.bf16 %v167_v10, %v166_v9  ;;  %v150_v13 = vld [vmem:[%s812_s19 + $0x10] sm:$0xff]  ;;  %v151_v14 = vld [vmem:[%s812_s19 + $0x18] sm:$0xff]  ;;  %v168_v15 = vld [vmem:[%s812_s19 + $0xa0] sm:$0xff] }
  0x13   : > { %689 = vmatprep.subr.msk.bf16.mxu0 %vm816_vm1, %v687_v7  ;;  %v169_v16 = vld [vmem:[%s812_s19 + $0xa8] sm:$0xff]  ;;  %v696_v17 = vpack.c.bf16 %v151_v14, %v150_v13  ;;  %v152_v19 = vld [vmem:[%s812_s19 + $0x20] sm:$0xff]  ;;  %v170_v21 = vld [vmem:[%s812_s19 + $0xb0] sm:$0xff] }
  0x14   : > { %692 = vmatpush3.bf16.xpose.msk.msra.mxu0 %vm816_vm1, %v690_v11  ;;  %v699_v18 = vpack.c.bf16 %v169_v16, %v168_v15  ;;  %v153_v20 = vld [vmem:[%s812_s19 + $0x28] sm:$0xff]  ;;  %v171_v22 = vld [vmem:[%s812_s19 + $0xb8] sm:$0xff]  ;;  %v154_v25 = vld [vmem:[%s812_s19 + $0x30] sm:$0xff] }
  0x15   : > { %695 = vmatprep.subr.msk.bf16.mxu0 %vm816_vm1, %v693_v12  ;;  %v702_v23 = vpack.c.bf16 %v153_v20, %v152_v19  ;;  %v705_v24 = vpack.c.bf16 %v171_v22, %v170_v21  ;;  %v155_v26 = vld [vmem:[%s812_s19 + $0x38] sm:$0xff]  ;;  %v172_v27 = vld [vmem:[%s812_s19 + $0xc0] sm:$0xff]  ;;  %v173_v28 = vld [vmem:[%s812_s19 + $0xc8] sm:$0xff] }
  0x16   : > { %v708_v29 = vpack.c.bf16 %v155_v26, %v154_v25  ;;  %v711_v30 = vpack.c.bf16 %v173_v28, %v172_v27  ;;  %v156_v31 = vld [vmem:[%s812_s19 + $0x40] sm:$0xff]  ;;  %v157_v32 = vld [vmem:[%s812_s19 + $0x48] sm:$0xff]  ;;  %v174_v33 = vld [vmem:[%s812_s19 + $0xd0] sm:$0xff]  ;;  %v541_v25 = vlaneseq }
  0x17   : > { %v175_v34 = vld [vmem:[%s812_s19 + $0xd8] sm:$0xff]  ;;  %v714_v35 = vpack.c.bf16 %v157_v32, %v156_v31  ;;  %v158_v37 = vld [vmem:[%s812_s19 + $0x50] sm:$0xff]  ;;  %v176_v39 = vld [vmem:[%s812_s19 + $0xe0] sm:$0xff] }
  0x18   : > { %v717_v36 = vpack.c.bf16 %v175_v34, %v174_v33  ;;  %v159_v38 = vld [vmem:[%s812_s19 + $0x58] sm:$0xff]  ;;  %v177_v40 = vld [vmem:[%s812_s19 + $0xe8] sm:$0xff]  ;;  %v160_v43 = vld [vmem:[%s812_s19 + $0x60] sm:$0xff]  ;;  %v542_v28 = vshrl.u32 %v541_v25, 7  ;;  %vm555_vm2 = vcmp.lt.s32.totalorder %v541_v25, 256 }
  0x19   : > { %v720_v41 = vpack.c.bf16 %v159_v38, %v158_v37  ;;  %v723_v42 = vpack.c.bf16 %v177_v40, %v176_v39  ;;  %v161_v44 = vld [vmem:[%s812_s19 + $0x68] sm:$0xff]  ;;  %v178_v45 = vld [vmem:[%s812_s19 + $0xf0] sm:$0xff]  ;;  %v179_v46 = vld [vmem:[%s812_s19 + $0xf8] sm:$0xff] }
  0x1a   : > { %v726_v47 = vpack.c.bf16 %v161_v44, %v160_v43  ;;  %v729_v48 = vpack.c.bf16 %v179_v46, %v178_v45  ;;  %v162_v49 = vld [vmem:[%s812_s19 + $0x70] sm:$0xff]  ;;  %v163_v50 = vld [vmem:[%s812_s19 + $0x78] sm:$0xff] }
  0x1b   : > { %v732_v51 = vpack.c.bf16 %v163_v50, %v162_v49 }
  0x1c   : > { %698 = vmatpush3.bf16.xpose.msk.msra.mxu0 %vm816_vm1, %v696_v17 }
  0x1d   : > { %701 = vmatprep.subr.msk.bf16.mxu0 %vm816_vm1, %v699_v18 }
  0x24   : > { %704 = vmatpush3.bf16.xpose.msk.msra.mxu0 %vm816_vm1, %v702_v23  ;;  %v770_v23 = vmov 1966171168  }
  0x25   : > { %707 = vmatprep.subr.msk.bf16.mxu0 %vm816_vm1, %v705_v24  ;;  %v539_v24 = vunpack.c.l.s4 %v770_v23 }
  0x27   : > { %v540_v27 = vunpack.c.0.s8 %v539_v24 }
  0x29   : > { %v543_v34 = vsub.s32 %v540_v27, %v542_v28 }
  0x2c   : > { %710 = vmatpush3.bf16.xpose.msk.msra.mxu0 %vm816_vm1, %v708_v29 }
  0x2d   : > { %713 = vmatprep.subr.msk.bf16.mxu0 %vm816_vm1, %v711_v30 }
  0x34   : > { %716 = vmatpush3.bf16.xpose.msk.msra.mxu0 %vm816_vm1, %v714_v35 }
  0x35   : > { %719 = vmatprep.subr.msk.bf16.mxu0 %vm816_vm1, %v717_v36 }
  0x3c   : > { %722 = vmatpush3.bf16.xpose.msk.msra.mxu0 %vm816_vm1, %v720_v41 }
  0x3d   : > { %725 = vmatprep.subr.msk.bf16.mxu0 %vm816_vm1, %v723_v42 }
  0x44   : > { %728 = vmatpush3.bf16.xpose.msk.msra.mxu0 %vm816_vm1, %v726_v47 }
  0x45   : > { %731 = vmatprep.subr.msk.bf16.mxu0 %vm816_vm1, %v729_v48 }
  0x4c   : > { %734 = vmatpush3.bf16.xpose.msk.msra.mxu0 %vm816_vm1, %v732_v51 }
  0x53   : > { %686 = vmatmul.mubr.msk.f32.vlgmr.msra.gmra.mrb[0].mxu0 %vm185_vm0, %v799_v0  ;;  %v147_v0 = vld [vmem:[%s902_s1 + $0x10] sm:$0xff] }
  0x54   : > { %451 = vperm.xlu1 %747, %v147_v0  }
  0x86   : > { %v183_v53 = vpop.permute.xlu0 %182 }
  0x8a   : > { %v366_v4 = vpop.permute.xlu0 %365 }
  0xd3   : > { %v452_v16 = vpop.permute.xlu1 %451 }
 0x126   : > { %v350_v54 = vpop.f32.mrb[0].mxu0 }
 0x127   : > { %v351_v55 = vadd.f32 %v350_v54, %v183_v53  ;;  %v352_v56 = vpop.f32.mrb[1].mxu0 }
 0x128   : > { %v353_v57 = vadd.f32 %v352_v56, %v183_v53 }
 0x129   : > { %v355_v58 = vmul.f32 0.5, %v351_v55 }
 0x12a   : > { %v356_v59 = vmul.f32 0.5, %v353_v57 }
 0x12b   : > { %748 = vtanh.f32 %v355_v58 }
 0x12c   : > { %750 = vtanh.f32 %v356_v59 }
 0x135   : > { %v749_v60 = vpop.eup %748 }
 0x136   : > { %v751_v61 = vpop.eup %750  ;;  %v359_v62 = vadd.f32 1.0, %v749_v60 }
 0x137   : > { %v360_v63 = vadd.f32 1.0, %v751_v61 }
 0x138   : > { %v361_v3 = vmul.f32 0.5, %v359_v62 }
 0x139   : > { %v362_v1 = vmul.f32 0.5, %v360_v63 }
 0x13b   : > { %370 = vmatprep.subr.mxu1 %v362_v1 }
 0x13c   : > { %371 = vmatpush1.msra.mxu1 %v361_v3 }
 0x13d   : > { %649 = vmatmul.mubr.msk.f32.vlgmr.msra.gmra.mrb[0].mxu1 %vm185_vm0, %v807_v2 }
 0x13e   : > { %520 = vmatprep.mubr.f32.mxu1 %v769_v52 }
 0x210   : > { %v436_v5 = vpop.f32.mrb[0].mxu1 }
 0x211   : > { %v437_v6 = vadd.f32 %v436_v5, %v366_v4  ;;  %v438_v7 = vpop.f32.mrb[1].mxu1 }
 0x212   : > { %v439_v8 = vadd.f32 %v438_v7, %v366_v4 }
 0x213   : > { %v441_v9 = vmul.f32 0.5, %v437_v6 }
 0x214   : > { %v442_v10 = vmul.f32 0.5, %v439_v8 }
 0x215   : > { %752 = vtanh.f32 %v441_v9 }
 0x216   : > { %754 = vtanh.f32 %v442_v10 }
 0x21f   : > { %v753_v11 = vpop.eup %752 }
 0x220   : > { %v755_v12 = vpop.eup %754  ;;  %v445_v13 = vadd.f32 1.0, %v753_v11 }
 0x221   : > { %v446_v14 = vadd.f32 1.0, %v755_v12 }
 0x222   : > { %v447_v15 = vmul.f32 0.5, %v445_v13 }
 0x223   : > { %v448_v2 = vmul.f32 0.5, %v446_v14 }
 0x225   : > { %456 = vmatprep.subr.mxu1 %v448_v2 }
 0x226   : > { %457 = vmatpush1.msra.mxu1 %v447_v15 }
 0x227   : > { %650 = vmatmul.mubr.msk.f32.vlgmr.msra.gmra.mrb[2].mxu1 %vm185_vm0, %v147_v0 }
 0x2fa   : > { %v522_v17 = vpop.f32.mrb[2].mxu1 }
 0x2fb   : > { %v523_v18 = vadd.f32 %v522_v17, %v452_v16  ;;  %v524_v19 = vpop.f32.mrb[3].mxu1 }
 0x2fc   : > { %v525_v20 = vadd.f32 %v524_v19, %v452_v16 }
 0x2fd   : > { %v527_v21 = vmul.f32 0.5, %v523_v18 }
 0x2fe   : > { %v528_v22 = vmul.f32 0.5, %v525_v20 }
 0x2ff   : > { %756 = vtanh.f32 %v527_v21 }
 0x300   : > { %758 = vtanh.f32 %v528_v22 }
 0x309   : > { %v757_v26 = vpop.eup %756 }
 0x30a   : > { %v759_v29 = vpop.eup %758  ;;  %v531_v30 = vadd.f32 1.0, %v757_v26 }
 0x30b   : > { %v532_v31 = vadd.f32 1.0, %v759_v29 }
 0x30c   : > { %v533_v32 = vmul.f32 0.5, %v531_v30 }
 0x30d   : > { %v534_v33 = vmul.f32 0.5, %v532_v31 }
 0x30f   : > { %v537_v35 = vcombine.low %v533_v32, %v534_v33 }
 0x311   : > { %v544_v36 = vrot.slane %v537_v35, %v543_v34 }
 0x313   : > { %v551_v37 = vrot.slane %v544_v36, %v543_v34 }
 0x315   : > { %557 = vst.msk [vmem:[%s143_s25] sm:$0x3] %vm555_vm2, %v551_v37 }
 0x316 PF: > { %s12_s9 = sadd.s32 1, %s766_s9  }
 0x317   : > { %p9_p5 = scmp.ge.s32.totalorder %s12_s9, 5  }
 0x319   :  { %11 = sbr.rel (!%p9_p5) target bundleno = 1 (0x1), region = 58 }

</bundles_post_ra>
